<compile_context>
chip_gen: v7x
topology: tpu7x:2x2x1
jax: 0.10.0
libtpu: 0.0.40
codegen_flags: <defaults>
</compile_context>

<pallas_src>
import jax
import jax.numpy as jnp
from jax.experimental import pallas as pl
from jax.experimental.pallas import tpu as pltpu


def _fnn_kernel(xT_ref, w1t_ref, w2_ref, out_ref):
    """Feature-major FNN forward.

    xT_ref : (2, tm)       batch on the 128-lane axis
    w1t_ref: (32, 2)       hidden units on sublanes (VMEM-resident)
    w2_ref : (32, 1)       (VMEM-resident)
    out_ref: (1, tm)       lane-dense output block
    """
    xT = xT_ref[...]                      # (2, tm)
    w1t = w1t_ref[...]                    # (32, 2)

    # Layer 1: X @ w1 with K=2  ->  two broadcast multiplies + one add (pure VPU).
    #   (32,1)*(1,tm) + (32,1)*(1,tm) -> (32, tm)
    y1 = w1t[:, 0:1] * xT[0:1, :] + w1t[:, 1:2] * xT[1:2, :]

    # Sigmoid on the EUP: each push covers 8 hidden units x 128 rows.
    # (If the bundle dump ever shows a VPU divide here, switch to
    #  pl.reciprocal(1 + exp(-y), approx=True); kept exact for tolerance.)
    y2 = jax.nn.sigmoid(y1)               # (32, tm)

    # Layer 2: y2 @ w2 with N=1 -> broadcast multiply + sublane reduce (VPU+XLU).
    y3 = jnp.sum(y2 * w2_ref[...], axis=0, keepdims=True)   # (1, tm)

    out_ref[...] = jax.nn.sigmoid(y3).astype(out_ref.dtype)


def fnn_forward(x, w1, w2, *, block_rows=32768, small_batch_max=8192):
    n, in_dim = x.shape
    hidden = w1.shape[1]
    out_dim = w2.shape[1]
    # The kernel hard-codes the FNN shape (2 -> hidden -> 1); fail loudly otherwise.
    assert in_dim == 2, f"FNN kernel expects input_dim=2, got {in_dim}"
    assert out_dim == 1, f"FNN kernel expects output_dim=1, got {out_dim}"
    assert w2.shape[0] == hidden

    # Feature-major, lane-dense presentation (done once in the wrapper).
    xT = jnp.transpose(x).astype(jnp.float32)    # (2, n)
    w1t = jnp.transpose(w1).astype(jnp.float32)  # (hidden, 2)
    w2f = w2.astype(jnp.float32)                 # (hidden, 1)

    if n <= small_batch_max:
        # Small batch: no grid machinery; whole arrays resident in VMEM.
        out = pl.pallas_call(
            _fnn_kernel,
            out_shape=jax.ShapeDtypeStruct((1, n), jnp.float32),
            in_specs=[pl.BlockSpec(memory_space=pltpu.MemorySpace.VMEM)] * 3,
            out_specs=pl.BlockSpec(memory_space=pltpu.MemorySpace.VMEM),
        )(xT, w1t, w2f)
        return out.reshape(n, out_dim)

    # Large batch: tile the (lane) batch axis; weights stay VMEM-resident
    # across grid steps via constant index_map.  No padding: pl.cdiv grid +
    # ragged last block (padded reads, masked writes) avoids extra HBM passes.
    tm = (min(block_rows, n) // 128) * 128        # multiple of 128, <= n
    grid = (pl.cdiv(n, tm),)
    out = pl.pallas_call(
        _fnn_kernel,
        out_shape=jax.ShapeDtypeStruct((1, n), jnp.float32),
        grid=grid,
        in_specs=[
            pl.BlockSpec((in_dim, tm), lambda i: (0, i)),      # streamed x block
            pl.BlockSpec((hidden, in_dim), lambda i: (0, 0)),  # VMEM-resident
            pl.BlockSpec((hidden, out_dim), lambda i: (0, 0)), # VMEM-resident
        ],
        out_specs=pl.BlockSpec((out_dim, tm), lambda i: (0, i)),
        compiler_params=pltpu.CompilerParams(
            dimension_semantics=("parallel",),        # both TCs on v7x
            vmem_limit_bytes=32 * 1024 * 1024,        # > v5e 16 MiB default, < v7x 64 MiB
        ),
    )(xT, w1t, w2f)
    return out.reshape(n, out_dim)


def fnn_forward_ref(x, w1, w2):
    # Pure-JAX reference mirroring FNN.forward (torch semantics) exactly.
    y1 = x @ w1
    y2 = 1.0 / (1.0 + jnp.exp(-y1))
    y3 = y2 @ w2
    return 1.0 / (1.0 + jnp.exp(-y3))


# TODO(synk): FNN.backward()/train() perform in-place SGD weight updates; only the
# forward pass is implemented as a kernel here.

if __name__ == "__main__":
    input_dim, hidden_dim, output_dim = 2, 32, 1
    batch = 8

    key = jax.random.PRNGKey(0)
    kx, kw1, kw2, kxl, kxr = jax.random.split(key, 5)

    # Deterministic "torch.randn"-like inputs / parameters.
    x = jax.random.normal(kx, (batch, input_dim), dtype=jnp.float32)
    w1 = jax.random.normal(kw1, (input_dim, hidden_dim), dtype=jnp.float32)
    w2 = jax.random.normal(kw2, (hidden_dim, output_dim), dtype=jnp.float32)

    # Small-batch (no-grid, whole-array VMEM) path.
    y = jax.block_until_ready(fnn_forward(x, w1, w2))
    y_ref = fnn_forward_ref(x, w1, w2)
    assert y.shape == (batch, output_dim)
    assert jnp.allclose(y, y_ref, atol=1e-5, rtol=1e-5), "small-batch mismatch"

    # Grid path, batch divisible by tile (force small thresholds to exercise it).
    xl = jax.random.normal(kxl, (2048, input_dim), dtype=jnp.float32)
    yl = jax.block_until_ready(
        fnn_forward(xl, w1, w2, block_rows=512, small_batch_max=256))
    yl_ref = fnn_forward_ref(xl, w1, w2)
    assert yl.shape == (2048, output_dim)
    assert jnp.allclose(yl, yl_ref, atol=1e-5, rtol=1e-5), "grid-path mismatch"

    # Grid path with a ragged last block (n not a multiple of the tile).
    xr = jax.random.normal(kxr, (1000, input_dim), dtype=jnp.float32)
    yr = jax.block_until_ready(
        fnn_forward(xr, w1, w2, block_rows=256, small_batch_max=256))
    yr_ref = fnn_forward_ref(xr, w1, w2)
    assert yr.shape == (1000, output_dim)
    assert jnp.allclose(yr, yr_ref, atol=1e-5, rtol=1e-5), "ragged-block mismatch"

    print("KERNEL_OK")
</pallas_src>

<mosaic_0001>
module attributes {stable_mosaic.version = 11 : i64} {
  func.func @_fnn_kernel(%arg0: memref<2x8xf32, #tpu.memory_space<vmem>>, %arg1: memref<32x2xf32, #tpu.memory_space<vmem>>, %arg2: memref<32x1xf32, #tpu.memory_space<vmem>>, %arg3: memref<1x8xf32, #tpu.memory_space<vmem>>) attributes {dimension_semantics = [], scalar_prefetch = 0 : i64, scratch_operands = 0 : i64, tpu.core_type = #tpu.core_type<tc>} {
    %c0 = arith.constant 0 : index
    %c0_0 = arith.constant 0 : index
    %0 = vector.load %arg0[%c0, %c0_0] : memref<2x8xf32, #tpu.memory_space<vmem>>, vector<2x8xf32>
    %c0_1 = arith.constant 0 : index
    %c0_2 = arith.constant 0 : index
    %1 = vector.load %arg1[%c0_1, %c0_2] : memref<32x2xf32, #tpu.memory_space<vmem>>, vector<32x2xf32>
    %2 = vector.extract_strided_slice %1 {offsets = [0, 0], sizes = [32, 1], strides = [1, 1]} : vector<32x2xf32> to vector<32x1xf32>
    %3 = vector.extract_strided_slice %0 {offsets = [0, 0], sizes = [1, 8], strides = [1, 1]} : vector<2x8xf32> to vector<1x8xf32>
    %4 = vector.broadcast %2 : vector<32x1xf32> to vector<32x8xf32>
    %5 = vector.broadcast %3 : vector<1x8xf32> to vector<32x8xf32>
    %6 = arith.mulf %4, %5 : vector<32x8xf32>
    %7 = vector.extract_strided_slice %1 {offsets = [0, 1], sizes = [32, 1], strides = [1, 1]} : vector<32x2xf32> to vector<32x1xf32>
    %8 = vector.extract_strided_slice %0 {offsets = [1, 0], sizes = [1, 8], strides = [1, 1]} : vector<2x8xf32> to vector<1x8xf32>
    %9 = vector.broadcast %7 : vector<32x1xf32> to vector<32x8xf32>
    %10 = vector.broadcast %8 : vector<1x8xf32> to vector<32x8xf32>
    %11 = arith.mulf %9, %10 : vector<32x8xf32>
    %12 = arith.addf %6, %11 : vector<32x8xf32>
    %13 = arith.negf %12 : vector<32x8xf32>
    %14 = math.exp %13 : vector<32x8xf32>
    %cst = arith.constant 1.000000e+00 : f32
    %15 = vector.broadcast %cst : f32 to vector<32x8xf32>
    %16 = arith.addf %15, %14 : vector<32x8xf32>
    %17 = arith.divf %15, %16 : vector<32x8xf32>
    %c0_3 = arith.constant 0 : index
    %c0_4 = arith.constant 0 : index
    %18 = vector.load %arg2[%c0_3, %c0_4] : memref<32x1xf32, #tpu.memory_space<vmem>>, vector<32x1xf32>
    %19 = vector.broadcast %18 : vector<32x1xf32> to vector<32x8xf32>
    %20 = arith.mulf %17, %19 : vector<32x8xf32>
    %cst_5 = arith.constant dense<0.000000e+00> : vector<8xf32>
    %21 = vector.multi_reduction <add>, %20, %cst_5 [0] : vector<32x8xf32> to vector<8xf32>
    %22 = vector.shape_cast %21 : vector<8xf32> to vector<1x8xf32>
    %23 = arith.negf %22 : vector<1x8xf32>
    %24 = math.exp %23 : vector<1x8xf32>
    %cst_6 = arith.constant 1.000000e+00 : f32
    %25 = vector.broadcast %cst_6 : f32 to vector<1x8xf32>
    %26 = arith.addf %25, %24 : vector<1x8xf32>
    %27 = arith.divf %25, %26 : vector<1x8xf32>
    %c0_7 = arith.constant 0 : index
    %c0_8 = arith.constant 0 : index
    %28 = vector.load %arg3[%c0_7, %c0_8] : memref<1x8xf32, #tpu.memory_space<vmem>>, vector<1x8xf32>
    tpu.vector_store %arg3[%c0_7, %c0_8], %27 {strides = array<i32>} : memref<1x8xf32, #tpu.memory_space<vmem>>, vector<1x8xf32>,
    return
  }
}

</mosaic_0001>

<bundles_post_ra>
// kernel: tpu_custom_call.1
= control target key start
LH: loop header
LB: loop body
LE: loop exit
PB: predicated region body
PF: predicated region fallthrough
CT: control target
= control target key end

     0   :  { %v219_v1 = vmov 1   ;;  %v220_v2 = vmov 0   ;;  %s281_s0 = inlined_call_operand.vmem [shape: f32[2,8], index: 0, kind: input, shape index: {}]   ;;  %s282_s1 = inlined_call_operand.vmem [shape: f32[32,2], index: 1, kind: input, shape index: {}]   ;;  %s283_s2 = inlined_call_operand.vmem [shape: f32[32,1], index: 2, kind: input, shape index: {}]   ;;  %s284_s3 = inlined_call_operand.hbm [shape: f32[1,8], index: 3, kind: output, shape index: {}]  }
   0x1   :  { %v16_v0 = vld [vmem:[%s282_s1] sm:$0xff]  ;;  %173 = vset.pattern.permute.xlu1 %v219_v1  ;;  %172 = vset.pattern.permute.xlu0 %v220_v2  ;;  %v17_v3 = vld [vmem:[%s282_s1 + $0x8] sm:$0xff] }
   0x2   :  { %49 = vperm.xlu1 %173, %v16_v0   ;;  %22 = vperm.xlu0 %172, %v16_v0  }
   0x3   :  { %8 = vsyncpa [#allocation3], 0  ;;  %v18_v4 = vld [vmem:[%s282_s1 + $0x10] sm:$0xff]  ;;  %v19_v5 = vld [vmem:[%s282_s1 + $0x18] sm:$0xff]  ;;  %v40_v10 = vlaneseq  ;;  %vm128_vm0 = vcmask 64512   ;;  %vm148_vm1 = vcmask 57344  }
   0x4   :  { %v100_v6 = vld [vmem:[%s283_s2] sm:$0xff]  ;;  %v101_v7 = vld [vmem:[%s283_s2 + $0x8] sm:$0xff]  ;;  %v102_v8 = vld [vmem:[%s283_s2 + $0x10] sm:$0xff] }
   0x5   :  { %v103_v9 = vld [vmem:[%s283_s2 + $0x18] sm:$0xff]  ;;  %v41_v11 = vshrl.u32 %v40_v10, 7  ;;  %v15_v14 = vld [vmem:[%s281_s0] sm:$0x3]  ;;  %s221_s0 = smov [#allocation2]  }
   0x6   :  { %53 = vperm.xlu1 %173, %v17_v3   ;;  %27 = vperm.xlu0 %172, %v17_v3   ;;  %s156_s2 = sshll.u32 %s221_s0, 4  ;;  %s157_s2 = int_to_ptr.vmem [resolvable:$true] %s156_s2 }
   0x7   :  { %v66_v12 = vsub.s32 1, %v41_v11  ;;  %v42_v13 = vsub.s32 0, %v41_v11  ;;  %s195_s29 = scalar_lea.vmem %s157_s2, 16  ;;  %s199_s30 = scalar_lea.vmem %s157_s2, 32 }
   0x8   :  { %p196_p0 = scmp.ne.s32.totalorder %s157_s2, %s195_s29  ;;  %p200_p1 = scmp.lt.s32.totalorder %s157_s2, %s157_s2 }
   0x9   :  { %v67_v15 = vrot.slane %v15_v14, %v66_v12  ;;  %v43_v16 = vrot.slane %v15_v14, %v42_v13  ;;  %p201_p2 = scmp.lt.s32.totalorder %s199_s30, %s195_s29 }
   0xa   :  { %57 = vperm.xlu1 %173, %v18_v4   ;;  %32 = vperm.xlu0 %172, %v18_v4  }
   0xb   :  { %p202_p3 = por %p201_p2, %p200_p1 }
   0xd   :  { %p203_p4 = pnand %p202_p3, %p196_p0 }
   0xe   :  { %61 = vperm.xlu1 %173, %v19_v5   ;;  %37 = vperm.xlu0 %172, %v19_v5  }
  0x12   :  { %106 = vperm.xlu0 %172, %v100_v6   ;;  %174 = vset.pattern.permute.xlu1 %v220_v2 }
  0x13   :  { %111 = vperm.xlu1 %174, %v101_v7  }
  0x16   :  { %116 = vperm.xlu0 %172, %v102_v8  }
  0x17   :  { %121 = vperm.xlu1 %174, %v103_v9  }
  0x81   :  { %v50_v17 = vpop.permute.xlu1 %49  ;;  %v23_v18 = vpop.permute.xlu0 %22 }
  0x82   :  { %v68_v19 = vmul.f32 %v67_v15, %v50_v17  ;;  %v44_v20 = vmul.f32 %v43_v16, %v23_v18 }
  0x84   :  { %v72_v21 = vadd.f32 %v68_v19, %v44_v20 }
  0x85   :  { %v54_v22 = vpop.permute.xlu1 %53  ;;  %v28_v23 = vpop.permute.xlu0 %27 }
  0x86   :  { %v164_v24 = vmul.f32 -1.442695, %v72_v21  ;;  %v69_v25 = vmul.f32 %v67_v15, %v54_v22  ;;  %v45_v26 = vmul.f32 %v43_v16, %v28_v23 }
  0x88   :  { %175 = vpow2.f32 %v164_v24  ;;  %v73_v27 = vadd.f32 %v69_v25, %v45_v26 }
  0x89   :  { %v58_v28 = vpop.permute.xlu1 %57  ;;  %v33_v29 = vpop.permute.xlu0 %32 }
  0x8a   :  { %v165_v30 = vmul.f32 -1.442695, %v73_v27  ;;  %v70_v31 = vmul.f32 %v67_v15, %v58_v28  ;;  %v46_v32 = vmul.f32 %v43_v16, %v33_v29 }
  0x8c   :  { %177 = vpow2.f32 %v165_v30  ;;  %v74_v33 = vadd.f32 %v70_v31, %v46_v32 }
  0x8d   :  { %v62_v34 = vpop.permute.xlu1 %61  ;;  %v38_v35 = vpop.permute.xlu0 %37 }
  0x8e   :  { %v166_v36 = vmul.f32 -1.442695, %v74_v33  ;;  %v71_v37 = vmul.f32 %v67_v15, %v62_v34  ;;  %v47_v38 = vmul.f32 %v43_v16, %v38_v35 }
  0x90   :  { %179 = vpow2.f32 %v166_v36  ;;  %v75_v39 = vadd.f32 %v71_v37, %v47_v38 }
  0x91   :  { %v107_v49 = vpop.permute.xlu0 %106 }
  0x92   :  { %v176_v40 = vpop.eup %175  ;;  %v167_v41 = vmul.f32 -1.442695, %v75_v39  ;;  %v112_v50 = vpop.permute.xlu1 %111 }
  0x93   :  { %v88_v42 = vadd.f32 1.0, %v176_v40 }
  0x94   :  { %181 = vpow2.f32 %v167_v41 }
  0x95   :  { %183 = vrcp.f32 %v88_v42  ;;  %v117_v56 = vpop.permute.xlu0 %116 }
  0x96   :  { %v178_v43 = vpop.eup %177  ;;  %v122_v63 = vpop.permute.xlu1 %121 }
  0x97   :  { %v89_v44 = vadd.f32 1.0, %v178_v43 }
  0x99   :  { %185 = vrcp.f32 %v89_v44 }
  0x9a   :  { %v180_v45 = vpop.eup %179 }
  0x9b   :  { %v90_v46 = vadd.f32 1.0, %v180_v45 }
  0x9d   :  { %187 = vrcp.f32 %v90_v46 }
  0x9e   :  { %v182_v47 = vpop.eup %181 }
  0x9f   :  { %v91_v48 = vadd.f32 1.0, %v182_v47  ;;  %v184_v51 = vpop.eup %183 }
  0xa0   :  { %v124_v54 = vmul.f32 %v184_v51, %v107_v49 }
  0xa1   :  { %189 = vrcp.f32 %v91_v48 }
  0xa2   :  { %v129_v59 = vsel %vm128_vm0, %v124_v54, 0.0 }
  0xa3   :  { %v186_v52 = vpop.eup %185 }
  0xa4   :  { %v125_v53 = vmul.f32 %v186_v52, %v112_v50 }
  0xa6   :  { %v130_v58 = vsel %vm128_vm0, %v125_v53, 0.0 }
  0xa7   :  { %v188_v55 = vpop.eup %187  ;;  %v131_v62 = vadd.f32 %v130_v58, %v129_v59 }
  0xa8   :  { %v126_v57 = vmul.f32 %v188_v55, %v117_v56 }
  0xaa   :  { %v132_v60 = vsel %vm128_vm0, %v126_v57, 0.0 }
  0xab   :  { %v190_v61 = vpop.eup %189  ;;  %v133_v1 = vadd.f32 %v132_v60, %v131_v62 }
  0xac   :  { %v127_v0 = vmul.f32 %v190_v61, %v122_v63 }
  0xae   :  { %v134_v2 = vsel %vm128_vm0, %v127_v0, 0.0 }
  0xaf   :  { %v135_v3 = vadd.f32 %v134_v2, %v133_v1 }
  0xb1   :  { %v136_v4 = vrot.slane %v135_v3, 4 }
  0xb3   :  { %v137_v5 = vadd.f32 %v136_v4, %v135_v3 }
  0xb5   :  { %v138_v6 = vrot.slane %v137_v5, 2 }
  0xb7   :  { %v139_v7 = vadd.f32 %v138_v6, %v137_v5 }
  0xb9   :  { %v140_v8 = vrot.slane %v139_v7, 1 }
  0xbb   :  { %v141_v9 = vadd.f32 %v140_v8, %v139_v7 }
  0xbd   :  { %v168_v10 = vmul.f32 -1.442695, %v141_v9 }
  0xbf   :  { %191 = vpow2.f32 %v168_v10 }
  0xc9   :  { %v192_v11 = vpop.eup %191 }
  0xca   :  { %v145_v12 = vadd.f32 1.0, %v192_v11 }
  0xcc   :  { %193 = vrcp.f32 %v145_v12 }
  0xd6   :  { %v194_v13 = vpop.eup %193 }
  0xd7   :  { %149 = vst.msk [vmem:[#allocation2] sm:$0x1] %vm148_vm1, %v194_v13 }
  0xd8   :  { %206 = shalt.err (!%p203_p4)
}
  0xd9   :  { %s207_s6 = scalar_lea.hbm %s284_s3, 16 }
  0xda   :  { %p208_p5 = scmp.ne.s32.totalorder %s284_s3, %s207_s6  ;;  %p211_p6 = scmp.lt.u32.totalorder %s207_s6, %s284_s3 }
  0xdc   :  { %p213_p7 = pnand %p211_p6, %p208_p5 }
  0xde   :  { %216 = shalt.err (!%p213_p7)
}
  0xdf   :  { %159 = dma.vmem_to_hbm [thread:$0]  %s157_s2, 16, %s284_s3, [#allocation3]  }
  0xe0   :  { %217 = dma.done.wait [#allocation3], 16  }
  0xe1   :  { %218 = vsyncadd [#allocation3], 4294967280 }
  0xe2   :  { %163 = vsyncpa [#allocation3], 1 }

</bundles_post_ra>
